<compile_context>
chip_gen: v7x
topology: tpu7x:2x2x1
jax: 0.10.0
libtpu: 0.0.40
codegen_flags: <defaults>
</compile_context>

<pallas_src>
import functools

import numpy as np
import jax
import jax.numpy as jnp
from jax.experimental import pallas as pl
from jax.experimental.pallas import tpu as pltpu

_VMEM_LIMIT = 32 * 1024 * 1024  # safe on v5e/v6e/v7x


def _sigmoid(x):
    # divide goes to the EUP slot (free alongside VALU work)
    return pl.reciprocal(1.0 + jnp.exp(-x), approx=True)


# ---------------------------------------------------------------------------
# Kernel 1: fused encoder stub (1x1 conv + ReLU) + global average pool,
#           gridded over images ("parallel").  Optionally also emits the full
#           per-image feature map (only needed when projector=True).
# ---------------------------------------------------------------------------
def _enc_gap_kernel(x_ref, w_ref, b_ref, *out_refs, c_in, need_feat):
    pool_ref = out_refs[0]
    x = x_ref[...]                      # (P, C_in)   P = H*W
    w = w_ref[...]                      # (C_in, nf)
    P = x.shape[0]
    nf = w.shape[1]
    # 1x1 conv == per-pixel matmul with K=C_in (tiny); do it as unrolled
    # broadcast-mul-adds on the VPU instead of underfilling the MXU.
    acc = jnp.broadcast_to(b_ref[...], (P, nf))
    for c in range(c_in):
        acc = acc + x[:, c:c + 1] * w[c:c + 1, :]
    feat = jnp.maximum(acc, 0.0)        # ReLU
    pool_ref[...] = jnp.mean(feat, axis=0, keepdims=True)   # (1, nf)
    if need_feat:
        out_refs[1][...] = feat                              # (P, nf)


def encoder_gap_pool(x_rows, w, b, need_feat):
    """x_rows: (N, H*W, C_in) f32 -> pooled (N, nf) [, feat (N, H*W, nf)]."""
    N, P, C = x_rows.shape
    nf = w.shape[1]
    kernel = functools.partial(_enc_gap_kernel, c_in=C, need_feat=need_feat)

    out_shape = [jax.ShapeDtypeStruct((N, 1, nf), jnp.float32)]
    out_specs = [pl.BlockSpec((None, 1, nf), lambda i: (i, 0, 0))]
    if need_feat:
        out_shape.append(jax.ShapeDtypeStruct((N, P, nf), jnp.float32))
        out_specs.append(pl.BlockSpec((None, P, nf), lambda i: (i, 0, 0)))

    outs = pl.pallas_call(
        kernel,
        out_shape=tuple(out_shape),
        grid=(N,),
        in_specs=[
            pl.BlockSpec((None, P, C), lambda i: (i, 0, 0)),
            pl.BlockSpec((C, nf), lambda i: (0, 0)),
            pl.BlockSpec((1, nf), lambda i: (0, 0)),
        ],
        out_specs=tuple(out_specs),
        compiler_params=pltpu.CompilerParams(
            dimension_semantics=("parallel",),
            vmem_limit_bytes=_VMEM_LIMIT,
        ),
    )(x_rows, w, b.reshape(1, nf))

    pooled = outs[0].reshape(N, nf)
    feat = outs[1] if need_feat else None
    return pooled, feat


# ---------------------------------------------------------------------------
# Kernel 2: batched gated-attention MIL aggregator (Linear_Classifier2.forward)
#   all bags in one call, grid=(num_bags,), padded instances masked.
#   A_V = tanh(h Wv + bv); A_U = sigmoid(h Wu + bu)
#   scores = (A_V*A_U) Ww + bw ; A = softmax over (valid) instances
#   feat_pred = sigmoid(h Wfc + bfc) ; Y_prob = A^T feat_pred ; ins = sigmoid(scores)
# ---------------------------------------------------------------------------
def _mil_kernel(h_ref, m_ref, wv_ref, bv_ref, wu_ref, bu_ref, ww_ref, bw_ref,
                wfc_ref, bfc_ref, yprob_ref, ins_ref):
    h = h_ref[...]                       # (Kmax, nf)
    m = m_ref[...]                       # (Kmax, 1)  1 = valid, 0 = pad
    a_v = jnp.tanh(jnp.dot(h, wv_ref[...], preferred_element_type=jnp.float32)
                   + bv_ref[...])
    a_u = _sigmoid(jnp.dot(h, wu_ref[...], preferred_element_type=jnp.float32)
                   + bu_ref[...])
    scores = jnp.dot(a_v * a_u, ww_ref[...],
                     preferred_element_type=jnp.float32) + bw_ref[...]   # (Kmax, 1)
    masked = jnp.where(m > 0, scores, jnp.float32(-1e30))
    mx = jnp.max(masked, axis=0, keepdims=True)
    e = jnp.exp(masked - mx)
    inv_den = pl.reciprocal(jnp.sum(e, axis=0, keepdims=True), approx=True)
    attn = e * inv_den                                                   # (Kmax, 1)
    feat_pred = _sigmoid(jnp.dot(h, wfc_ref[...],
                                 preferred_element_type=jnp.float32) + bfc_ref[...])
    yprob_ref[...] = jnp.sum(attn * feat_pred, axis=0, keepdims=True)    # (1, C)
    ins_ref[...] = _sigmoid(scores) * m                                  # (Kmax, 1)


def mil_aggregate_batched(h_bags, mask, wv, bv, wu, bu, ww, bw, wfc, bfc):
    """h_bags: (B, Kmax, nf), mask: (B, Kmax, 1) -> yprob (B,1,C), ins (B,Kmax,1)."""
    B, Kmax, nf = h_bags.shape
    L = wv.shape[1]
    C = wfc.shape[1]
    yprob, ins = pl.pallas_call(
        _mil_kernel,
        out_shape=(jax.ShapeDtypeStruct((B, 1, C), jnp.float32),
                   jax.ShapeDtypeStruct((B, Kmax, 1), jnp.float32)),
        grid=(B,),
        in_specs=[
            pl.BlockSpec((None, Kmax, nf), lambda b: (b, 0, 0)),
            pl.BlockSpec((None, Kmax, 1), lambda b: (b, 0, 0)),
            pl.BlockSpec((nf, L), lambda b: (0, 0)),
            pl.BlockSpec((1, L), lambda b: (0, 0)),
            pl.BlockSpec((nf, L), lambda b: (0, 0)),
            pl.BlockSpec((1, L), lambda b: (0, 0)),
            pl.BlockSpec((L, 1), lambda b: (0, 0)),
            pl.BlockSpec((1, 1), lambda b: (0, 0)),
            pl.BlockSpec((nf, C), lambda b: (0, 0)),
            pl.BlockSpec((1, C), lambda b: (0, 0)),
        ],
        out_specs=(pl.BlockSpec((None, 1, C), lambda b: (b, 0, 0)),
                   pl.BlockSpec((None, Kmax, 1), lambda b: (b, 0, 0))),
        compiler_params=pltpu.CompilerParams(
            dimension_semantics=("parallel",),
            vmem_limit_bytes=_VMEM_LIMIT,
        ),
    )(h_bags, mask, wv, bv.reshape(1, L), wu, bu.reshape(1, L),
      ww, bw.reshape(1, 1), wfc, bfc.reshape(1, C))
    return yprob, ins


# ---------------------------------------------------------------------------
# Kernel 3: fused projector  Linear -> ReLU -> Linear -> L2-normalize(dim=1)
#           (output last dim = feat_dim = 128: lane-dense stores)
# ---------------------------------------------------------------------------
def _proj_kernel(x_ref, w1_ref, b1_ref, w2_ref, b2_ref, o_ref):
    h = jnp.dot(x_ref[...], w1_ref[...], preferred_element_type=jnp.float32) + b1_ref[...]
    h = jnp.maximum(h, 0.0)
    p = jnp.dot(h, w2_ref[...], preferred_element_type=jnp.float32) + b2_ref[...]
    norm = jnp.sqrt(jnp.sum(p * p, axis=1, keepdims=True))
    inv = pl.reciprocal(jnp.maximum(norm, 1e-12), approx=True)
    o_ref[...] = p * inv


def project(x_flat, w1, b1, w2, b2):
    N = x_flat.shape[0]
    D = w2.shape[1]
    return pl.pallas_call(
        _proj_kernel,
        out_shape=jax.ShapeDtypeStruct((N, D), jnp.float32),
        compiler_params=pltpu.CompilerParams(vmem_limit_bytes=_VMEM_LIMIT),
    )(x_flat, w1, b1.reshape(1, -1), w2, b2.reshape(1, -1))


# ---------------------------------------------------------------------------
# Parameter init (deterministic, PyTorch-Linear-style uniform bounds).
# ---------------------------------------------------------------------------
def _init_linear(key, fan_in, fan_out):
    kw, kb = jax.random.split(key)
    bound = 1.0 / float(fan_in) ** 0.5
    w = jax.random.uniform(kw, (fan_in, fan_out), jnp.float32, -bound, bound)
    b = jax.random.uniform(kb, (fan_out,), jnp.float32, -bound, bound)
    return w, b


class EmbeddingModelPallas:
    """JAX/Pallas equivalent of Embeddingmodel (small synthetic encoder)."""

    def __init__(self, key, c_in=4, nf=32, L=256, num_classes=1, feat_dim=128, spatial=8):
        keys = jax.random.split(key, 7)
        self.nf = nf
        self.num_classes = num_classes
        # TODO(synk): pretrained timm/EfficientNet backbone has no in-script
        # equivalent; replaced by a deterministic 1x1-conv + ReLU stub.
        self.enc_w, self.enc_b = _init_linear(keys[0], c_in, nf)
        # aggregator = Linear_Classifier2(nf, num_classes, L=256)
        self.wv, self.bv = _init_linear(keys[1], nf, L)
        self.wu, self.bu = _init_linear(keys[2], nf, L)
        self.ww, self.bw = _init_linear(keys[3], L, 1)
        self.wfc, self.bfc = _init_linear(keys[4], nf, num_classes)
        # projector = Linear(nf*H*W, 512) -> ReLU -> Linear(512, feat_dim)
        # wp1 rows are in HWC-flat order (instead of PyTorch's CHW-flat): with a
        # random init this is an equivalent permutation and lets the projector
        # consume feat directly without an NHWC->NCHW transpose.
        flat = spatial * spatial * nf
        self.wp1, self.bp1 = _init_linear(keys[5], flat, 512)
        self.wp2, self.bp2 = _init_linear(keys[6], 512, feat_dim)

    def forward(self, all_images, projector=False, pred_on=False):
        if pred_on:
            split_sizes = [int(bag.shape[0]) for bag in all_images]
            x = jnp.concatenate(all_images, axis=0)
        else:
            split_sizes = None
            x = all_images

        # encoder stub + global average pool, fused, grid over images
        N, C, H, W = x.shape
        x_rows = jnp.transpose(x, (0, 2, 3, 1)).reshape(N, H * W, C)
        pooled, feat = encoder_gap_pool(x_rows, self.enc_w, self.enc_b,
                                        need_feat=projector)

        bag_pred = None
        bag_instance_predictions = None
        if pred_on:
            # TODO(synk): reference computes split_sizes AFTER torch.cat and feeds the
            # un-pooled 4-D `feat` to nn.Linear(nf, L) (both would crash at runtime);
            # implemented the evident intent: per-bag split of pooled (k, nf) features.
            B = len(split_sizes)
            Kmax = max(split_sizes)
            bags, masks = [], []
            start = 0
            for k in split_sizes:
                hb = pooled[start:start + k]
                if k < Kmax:
                    hb = jnp.pad(hb, ((0, Kmax - k), (0, 0)))
                bags.append(hb)
                mrow = np.zeros((Kmax, 1), np.float32)
                mrow[:k] = 1.0
                masks.append(mrow)
                start += k
            h_bags = jnp.stack(bags)                       # (B, Kmax, nf)
            mask = jnp.asarray(np.stack(masks))            # (B, Kmax, 1)

            yprob, ins = mil_aggregate_batched(
                h_bags, mask, self.wv, self.bv, self.wu, self.bu,
                self.ww, self.bw, self.wfc, self.bfc)
            bag_pred = yprob.reshape(B, self.num_classes)
            bag_instance_predictions = [ins[i, :k, 0] for i, k in enumerate(split_sizes)]

        proj = None
        if projector:
            feat_flat = feat.reshape(N, -1)   # HWC-flat (free reshape); wp1 matches
            proj = project(feat_flat, self.wp1, self.bp1, self.wp2, self.bp2)

        return bag_pred, bag_instance_predictions, proj


if __name__ == "__main__":
    key = jax.random.PRNGKey(0)
    k_model, k_b0, k_b1 = jax.random.split(key, 3)

    # small shapes: 2 bags of 4 images each, NCHW = (4, 4, 8, 8)
    bag0 = jax.random.normal(k_b0, (4, 4, 8, 8), jnp.float32)
    bag1 = jax.random.normal(k_b1, (4, 4, 8, 8), jnp.float32)

    model = EmbeddingModelPallas(k_model, c_in=4, nf=32, L=256,
                                 num_classes=1, feat_dim=128, spatial=8)

    bag_pred, bag_ins, proj = model.forward([bag0, bag1], projector=True, pred_on=True)

    jax.block_until_ready(bag_pred)
    for yi in bag_ins:
        jax.block_until_ready(yi)
    jax.block_until_ready(proj)

    assert bag_pred.shape == (2, 1)
    assert all(yi.shape == (4,) for yi in bag_ins)
    assert proj.shape == (8, 128)
    assert bool(jnp.all(jnp.isfinite(bag_pred)))
    assert bool(jnp.all(jnp.isfinite(proj)))
    print("KERNEL_OK")
</pallas_src>

<mosaic_0001>
module attributes {stable_mosaic.version = 11 : i64} {
  func.func @_enc_gap_kernel(%arg0: i32, %arg1: memref<1x64x4xf32, #tpu.memory_space<vmem>>, %arg2: memref<4x32xf32, #tpu.memory_space<vmem>>, %arg3: memref<1x32xf32, #tpu.memory_space<vmem>>, %arg4: memref<1x1x32xf32, #tpu.memory_space<vmem>>, %arg5: memref<1x64x32xf32, #tpu.memory_space<vmem>>) attributes {dimension_semantics = [#tpu.dimension_semantics<parallel>], iteration_bounds = array<i64: 8>, scalar_prefetch = 0 : i64, scratch_operands = 0 : i64, tpu.core_type = #tpu.core_type<tc>, window_params = [{transform_indices = @transform_0, window_bounds = array<i64: 1, 64, 4>}, {pipeline_mode = #tpu.pipeline_mode<synchronous>, transform_indices = @transform_1, window_bounds = array<i64: 4, 32>}, {pipeline_mode = #tpu.pipeline_mode<synchronous>, transform_indices = @transform_2, window_bounds = array<i64: 1, 32>}, {transform_indices = @transform_3, window_bounds = array<i64: 1, 1, 32>}, {transform_indices = @transform_4, window_bounds = array<i64: 1, 64, 32>}]} {
    %c0 = arith.constant 0 : index
    %c0_0 = arith.constant 0 : index
    %c0_1 = arith.constant 0 : index
    %0 = vector.load %arg1[%c0, %c0_0, %c0_1] : memref<1x64x4xf32, #tpu.memory_space<vmem>>, vector<1x64x4xf32>
    %1 = vector.shape_cast %0 : vector<1x64x4xf32> to vector<64x4xf32>
    %c0_2 = arith.constant 0 : index
    %c0_3 = arith.constant 0 : index
    %2 = vector.load %arg2[%c0_2, %c0_3] : memref<4x32xf32, #tpu.memory_space<vmem>>, vector<4x32xf32>
    %c0_4 = arith.constant 0 : index
    %c0_5 = arith.constant 0 : index
    %3 = vector.load %arg3[%c0_4, %c0_5] : memref<1x32xf32, #tpu.memory_space<vmem>>, vector<1x32xf32>
    %4 = vector.shape_cast %3 : vector<1x32xf32> to vector<1x32xf32>
    %5 = vector.broadcast %4 : vector<1x32xf32> to vector<64x32xf32>
    %6 = vector.extract_strided_slice %1 {offsets = [0, 0], sizes = [64, 1], strides = [1, 1]} : vector<64x4xf32> to vector<64x1xf32>
    %7 = vector.extract_strided_slice %2 {offsets = [0, 0], sizes = [1, 32], strides = [1, 1]} : vector<4x32xf32> to vector<1x32xf32>
    %8 = vector.broadcast %6 : vector<64x1xf32> to vector<64x32xf32>
    %9 = vector.broadcast %7 : vector<1x32xf32> to vector<64x32xf32>
    %10 = arith.mulf %8, %9 : vector<64x32xf32>
    %11 = arith.addf %5, %10 : vector<64x32xf32>
    %12 = vector.extract_strided_slice %1 {offsets = [0, 1], sizes = [64, 1], strides = [1, 1]} : vector<64x4xf32> to vector<64x1xf32>
    %13 = vector.extract_strided_slice %2 {offsets = [1, 0], sizes = [1, 32], strides = [1, 1]} : vector<4x32xf32> to vector<1x32xf32>
    %14 = vector.broadcast %12 : vector<64x1xf32> to vector<64x32xf32>
    %15 = vector.broadcast %13 : vector<1x32xf32> to vector<64x32xf32>
    %16 = arith.mulf %14, %15 : vector<64x32xf32>
    %17 = arith.addf %11, %16 : vector<64x32xf32>
    %18 = vector.extract_strided_slice %1 {offsets = [0, 2], sizes = [64, 1], strides = [1, 1]} : vector<64x4xf32> to vector<64x1xf32>
    %19 = vector.extract_strided_slice %2 {offsets = [2, 0], sizes = [1, 32], strides = [1, 1]} : vector<4x32xf32> to vector<1x32xf32>
    %20 = vector.broadcast %18 : vector<64x1xf32> to vector<64x32xf32>
    %21 = vector.broadcast %19 : vector<1x32xf32> to vector<64x32xf32>
    %22 = arith.mulf %20, %21 : vector<64x32xf32>
    %23 = arith.addf %17, %22 : vector<64x32xf32>
    %24 = vector.extract_strided_slice %1 {offsets = [0, 3], sizes = [64, 1], strides = [1, 1]} : vector<64x4xf32> to vector<64x1xf32>
    %25 = vector.extract_strided_slice %2 {offsets = [3, 0], sizes = [1, 32], strides = [1, 1]} : vector<4x32xf32> to vector<1x32xf32>
    %26 = vector.broadcast %24 : vector<64x1xf32> to vector<64x32xf32>
    %27 = vector.broadcast %25 : vector<1x32xf32> to vector<64x32xf32>
    %28 = arith.mulf %26, %27 : vector<64x32xf32>
    %29 = arith.addf %23, %28 : vector<64x32xf32>
    %cst = arith.constant 0.000000e+00 : f32
    %30 = vector.broadcast %cst : f32 to vector<64x32xf32>
    %31 = arith.maximumf %29, %30 : vector<64x32xf32>
    %cst_6 = arith.constant dense<0.000000e+00> : vector<32xf32>
    %32 = vector.multi_reduction <add>, %31, %cst_6 [0] : vector<64x32xf32> to vector<32xf32>
    %33 = vector.shape_cast %32 : vector<32xf32> to vector<1x32xf32>
    %cst_7 = arith.constant 6.400000e+01 : f32
    %34 = vector.broadcast %cst_7 : f32 to vector<1x32xf32>
    %35 = arith.divf %33, %34 : vector<1x32xf32>
    %c0_8 = arith.constant 0 : index
    %c0_9 = arith.constant 0 : index
    %c0_10 = arith.constant 0 : index
    %36 = vector.load %arg4[%c0_8, %c0_9, %c0_10] : memref<1x1x32xf32, #tpu.memory_space<vmem>>, vector<1x1x32xf32>
    %37 = vector.shape_cast %36 : vector<1x1x32xf32> to vector<1x32xf32>
    %38 = vector.shape_cast %35 : vector<1x32xf32> to vector<1x1x32xf32>
    tpu.vector_store %arg4[%c0_8, %c0_9, %c0_10], %38 {strides = array<i32>} : memref<1x1x32xf32, #tpu.memory_space<vmem>>, vector<1x1x32xf32>,
    %c0_11 = arith.constant 0 : index
    %c0_12 = arith.constant 0 : index
    %c0_13 = arith.constant 0 : index
    %39 = vector.load %arg5[%c0_11, %c0_12, %c0_13] : memref<1x64x32xf32, #tpu.memory_space<vmem>>, vector<1x64x32xf32>
    %40 = vector.shape_cast %39 : vector<1x64x32xf32> to vector<64x32xf32>
    %41 = vector.shape_cast %31 : vector<64x32xf32> to vector<1x64x32xf32>
    tpu.vector_store %arg5[%c0_11, %c0_12, %c0_13], %41 {strides = array<i32>} : memref<1x64x32xf32, #tpu.memory_space<vmem>>, vector<1x64x32xf32>,
    return
  }
  func.func @transform_0(%arg0: i32) -> (i32, i32, i32) {
    %c0_i32 = arith.constant 0 : i32
    %c0_i32_0 = arith.constant 0 : i32
    %c0_i32_1 = arith.constant 0 : i32
    return %arg0, %c0_i32, %c0_i32_0 : i32, i32, i32
  }
  func.func @transform_1(%arg0: i32) -> (i32, i32) {
    %c0_i32 = arith.constant 0 : i32
    %c0_i32_0 = arith.constant 0 : i32
    %c0_i32_1 = arith.constant 0 : i32
    return %c0_i32, %c0_i32_0 : i32, i32
  }
  func.func @transform_2(%arg0: i32) -> (i32, i32) {
    %c0_i32 = arith.constant 0 : i32
    %c0_i32_0 = arith.constant 0 : i32
    %c0_i32_1 = arith.constant 0 : i32
    return %c0_i32, %c0_i32_0 : i32, i32
  }
  func.func @transform_3(%arg0: i32) -> (i32, i32, i32) {
    %c0_i32 = arith.constant 0 : i32
    %c0_i32_0 = arith.constant 0 : i32
    %c0_i32_1 = arith.constant 0 : i32
    return %arg0, %c0_i32, %c0_i32_0 : i32, i32, i32
  }
  func.func @transform_4(%arg0: i32) -> (i32, i32, i32) {
    %c0_i32 = arith.constant 0 : i32
    %c0_i32_0 = arith.constant 0 : i32
    %c0_i32_1 = arith.constant 0 : i32
    return %arg0, %c0_i32, %c0_i32_0 : i32, i32, i32
  }
}

</mosaic_0001>

<bundles_post_ra>
// kernel: tpu_custom_call.1
= control target key start
LH: loop header
LB: loop body
LE: loop exit
PB: predicated region body
PF: predicated region fallthrough
CT: control target
= control target key end

     0   :  { %10 = vsyncpa [#allocation3], 0  ;;  %s970_s0 = inlined_call_operand.vmem [shape: f32[8,64,4], index: 0, kind: input, shape index: {}]   ;;  %s971_s1 = inlined_call_operand.vmem [shape: f32[4,32], index: 1, kind: input, shape index: {}]   ;;  %s972_s2 = inlined_call_operand.vmem [shape: f32[1,32], index: 2, kind: input, shape index: {}]   ;;  %s973_s3 = inlined_call_operand.hbm [shape: f32[8,1,32], index: 3, kind: output, shape index: {0}]   ;;  %s974_s4 = inlined_call_operand.vmem [shape: f32[8,64,32], index: 4, kind: output, shape index: {1}]  }
   0x1   :  { %12 = vsyncpa [#allocation3 + $0x1], 0  ;;  %s753_s15 = smov 0   ;;  %s755_s16 = smov 0  }
   0x2   :  { %s757_s17 = smov 0   ;;  %s759_s18 = smov 0  }
   0x3 LB: > { %s774_s19 = sadd.s32 4294967295, %s721_s18   ;;  %s583_s20 = sadd.s32 4294967294, %s721_s18   ;;  %s721_s18 = sphi %s759_s18, %s980_s18   ;;  %s717_s17 = sphi %s757_s17, %s979_s17   ;;  %s713_s16 = sphi %s755_s16, %s978_s16   ;;  %s709_s15 = sphi %s753_s15, %s977_s15  }
   0x4   : > { %s778_s21 = sadd.s32 1, %s721_s18   ;;  %s93_s22 = sadd.s32 1, %s717_s17 }
   0x5   : > { %s90_s23 = ssub.s32 %s721_s18, %s778_s21  ;;  %p103_p0 = scmp.ne.s32.totalorder %s717_s17, %s713_s16 }
   0x6   : > { %p91_p1 = scmp.eq.s32.totalorder %s90_s23, 0  ;;  %p104_p2 = scmp.eq.s32.totalorder %s774_s19, 7 }
   0x7   : > { %p109_p3 = scmp.ne.s32.totalorder %s713_s16, %s709_s15  ;;  %p110_p4 = scmp.eq.s32.totalorder %s583_s20, 7 }
   0x8   : > { %s789_s24 = scalar_select %p91_p1, %s717_s17, %s93_s22  }
   0x9   : > { %p791_p5 = por %p104_p2, %p103_p0  ;;  %p795_p6 = por %p110_p4, %p109_p3 }
   0xa   : > { %p586_p7 = scmp.ge.s32.totalorder %s721_s18, 1  ;;  %p168_p8 = scmp.lt.s32.totalorder %s721_s18, 9 }
   0xc   : > { %p169_p9 = pnand %p586_p7, %p168_p8 }
   0xd   : > { %p198_p10 = scmp.lt.s32.totalorder (!%p169_p9), %s774_s19, 7  ;;  %v723_v0 = vmov (!%p169_p9), 2   ;;  %v724_v1 = vmov (!%p169_p9), 0   ;;  %v725_v6 = vmov (!%p169_p9), 1   ;;  %v726_v10 = vmov (!%p169_p9), 3   ;;  %s189_s13 = sand.u32 (!%p169_p9), 1, %s713_s16  }
   0xe   : > { %172 = sbr.rel (%p169_p9) target bundleno = 277 (0x115), region = 32  ;;  %642 = vset.pattern.permute.xlu0 (!%p169_p9), %v723_v0  ;;  %640 = vset.pattern.permute.xlu1 (!%p169_p9), %v724_v1  ;;  %v264_v16 = vlaneseq (!%p169_p9)  ;;  %v216_v23 = vld [vmem:[%s971_s1] sm:$0xf] (!%p169_p9)  ;;  %vm448_vm0 = vcmask (!%p169_p9), 261120   ;;  %s592_s14 = sshll.u32 (!%p169_p9), %s774_s19, 4  ;;  %vm472_vm1 = vcmask (!%p169_p9), 253952  }
   0xf   : > { %v838_v31 = vld [vmem:[%s972_s2] ss:$0 sm:$0xff] (!%p169_p9)  ;;  %s190_s20 = scalar_lea.vmem (!%p169_p9), [#allocation2], %s189_s13  ;;  %s483_s29 = scalar_lea.sflag (!%p169_p9), [#allocation3], %s189_s13 }
  0x10   : > { %v265_v18 = vshrl.u32 (!%p169_p9), %v264_v16, 7  ;;  %s500_s22 = sshll.u32 (!%p169_p9), %s190_s20, 4  ;;  %s930_s22 = int_to_ptr.vmem [resolvable:$true] %s500_s22 }
  0x11   : > { %s659_s30 = scalar_lea.vmem (!%p169_p9), %s930_s22, 16 }
  0x12   : > { %v266_v20 = vsub.s32 (!%p169_p9), 0, %v265_v18  ;;  %v318_v25 = vsub.s32 (!%p169_p9), 1, %v265_v18  ;;  %v370_v29 = vsub.s32 (!%p169_p9), 2, %v265_v18  ;;  %v422_v38 = vsub.s32 (!%p169_p9), 3, %v265_v18  ;;  %p660_p11 = scmp.ne.s32.totalorder (!%p169_p9), %s930_s22, %s659_s30 }
  0x14   : > { %v830_v24 = vrot.slane (!%p169_p9), %v216_v23, %v266_v20  ;;  %v833_v30 = vrot.slane (!%p169_p9), %v216_v23, %v318_v25  ;;  %v843_v37 = vrot.slane (!%p169_p9), %v216_v23, %v370_v29  ;;  %v847_v44 = vrot.slane (!%p169_p9), %v216_v23, %v422_v38  ;;  %p661_p12 = pnand (!%p169_p9), %p660_p11, %p791_p5 }
  0x15   : > { %s803_s27 = scalar_select %p198_p10, %s774_s19, 7 }
  0x16   : > { %p662_p13 = pneg %p661_p12  ;;  %s727_s19 = smov [#allocation2]  }
  0x17   : > { %s595_s28 = sshll.u32 %s803_s27, 6 }
  0x18   : > { %s811_s5 = scalar_lea.vmem %s970_s0, %s595_s28  ;;  %s864_s12 = scalar_lea.vmem %s974_s4, %s595_s28 }
  0x19   : > { %v210_v2 = vld [vmem:[%s811_s5 + $0x10] sm:$0xff]  ;;  %v208_v3 = vld [vmem:[%s811_s5] sm:$0xff]  ;;  %v211_v4 = vld [vmem:[%s811_s5 + $0x18] sm:$0xff]  ;;  %s928_s28 = scalar_lea.hbm %s973_s3, %s592_s14 }
  0x1a   : > { %236 = vperm.xlu1 %640, %v210_v2   ;;  %337 = vperm.xlu0 %642, %v208_v3   ;;  %v213_v5 = vld [vmem:[%s811_s5 + $0x28] sm:$0xff]  ;;  %v212_v8 = vld [vmem:[%s811_s5 + $0x20] sm:$0xff]  ;;  %v215_v9 = vld [vmem:[%s811_s5 + $0x38] sm:$0xff] }
  0x1b   : > { %v209_v7 = vld [vmem:[%s811_s5 + $0x8] sm:$0xff]  ;;  %v214_v11 = vld [vmem:[%s811_s5 + $0x30] sm:$0xff]  ;;  %s663_s5 = sshll.u32 %s727_s19, 4  ;;  %s664_s5 = int_to_ptr.vmem [resolvable:$false] %s663_s5 }
  0x1c   : > { %s665_s6 = scalar_lea.vmem %s664_s5, 32  ;;  %p666_p0 = scmp.lt.s32.totalorder %s930_s22, %s664_s5 }
  0x1d   : > { %p667_p1 = scmp.lt.s32.totalorder %s665_s6, %s659_s30 }
  0x1e   : > { %241 = vperm.xlu1 %640, %v211_v4   ;;  %345 = vperm.xlu0 %642, %v210_v2  }
  0x1f   : > { %p668_p2 = por %p667_p1, %p666_p0 }
  0x21   : > { %p669_p3 = pnand %p668_p2, %p662_p13 }
  0x22   : > { %251 = vperm.xlu1 %640, %v213_v5   ;;  %645 = vset.pattern.permute.xlu0 %v725_v6 }
  0x23   : > { %285 = vperm.xlu0 %645, %v208_v3  }
  0x26   : > { %641 = vset.pattern.permute.xlu1 %v725_v6 }
  0x27   : > { %289 = vperm.xlu1 %641, %v209_v7   ;;  %305 = vperm.xlu0 %645, %v213_v5  }
  0x2b   : > { %293 = vperm.xlu1 %641, %v210_v2   ;;  %650 = vset.pattern.permute.xlu0 %v724_v1 }
  0x2c   : > { %226 = vperm.xlu0 %650, %v208_v3  }
  0x2f   : > { %643 = vset.pattern.permute.xlu1 %v723_v0 }
  0x30   : > { %341 = vperm.xlu1 %643, %v209_v7   ;;  %231 = vperm.xlu0 %650, %v209_v7  }
  0x34   : > { %644 = vset.pattern.permute.xlu1 %v725_v6  ;;  %246 = vperm.xlu0 %650, %v212_v8  }
  0x35   : > { %297 = vperm.xlu1 %644, %v211_v4  }
  0x38   : > { %261 = vperm.xlu0 %650, %v215_v9  }
  0x39   : > { %646 = vset.pattern.permute.xlu1 %v726_v10 }
  0x3a   : > { %389 = vperm.xlu1 %646, %v208_v3  }
  0x3c   : > { %653 = vset.pattern.permute.xlu0 %v726_v10 }
  0x3d   : > { %393 = vperm.xlu0 %653, %v209_v7  }
  0x3e   : > { %647 = vset.pattern.permute.xlu1 %v725_v6 }
  0x3f   : > { %301 = vperm.xlu1 %647, %v212_v8  }
  0x41   : > { %397 = vperm.xlu0 %653, %v210_v2  }
  0x43   : > { %648 = vset.pattern.permute.xlu1 %v723_v0 }
  0x44   : > { %349 = vperm.xlu1 %648, %v211_v4  }
  0x45   : > { %405 = vperm.xlu0 %653, %v212_v8  }
  0x48   : > { %649 = vset.pattern.permute.xlu1 %v724_v1 }
  0x49   : > { %256 = vperm.xlu1 %649, %v214_v11   ;;  %409 = vperm.xlu0 %653, %v213_v5  }
  0x4d   : > { %651 = vset.pattern.permute.xlu1 %v723_v0  ;;  %413 = vperm.xlu0 %653, %v214_v11  }
  0x4e   : > { %353 = vperm.xlu1 %651, %v212_v8  }
  0x52   : > { %652 = vset.pattern.permute.xlu1 %v726_v10 }
  0x53   : > { %401 = vperm.xlu1 %652, %v211_v4  }
  0x57   : > { %654 = vset.pattern.permute.xlu1 %v725_v6 }
  0x58   : > { %309 = vperm.xlu1 %654, %v214_v11  }
  0x5c   : > { %655 = vset.pattern.permute.xlu1 %v723_v0 }
  0x5d   : > { %357 = vperm.xlu1 %655, %v213_v5  }
  0x61   : > { %656 = vset.pattern.permute.xlu1 %v725_v6 }
  0x62   : > { %313 = vperm.xlu1 %656, %v215_v9  }
  0x66   : > { %657 = vset.pattern.permute.xlu1 %v723_v0 }
  0x67   : > { %361 = vperm.xlu1 %657, %v214_v11  }
  0x6b   : > { %365 = vperm.xlu1 %657, %v215_v9  }
  0x6f   : > { %658 = vset.pattern.permute.xlu1 %v726_v10 }
  0x70   : > { %417 = vperm.xlu1 %658, %v215_v9  }
  0x99   : > { %v237_v12 = vpop.permute.xlu1 %236  ;;  %v338_v13 = vpop.permute.xlu0 %337 }
  0x9a   : > { %v372_v40 = vmul.f32 %v843_v37, %v338_v13  ;;  %v270_v45 = vmul.f32 %v830_v24, %v237_v12 }
  0x9c   : > { %v278_v53 = vadd.f32 %v838_v31, %v270_v45 }
  0x9d   : > { %v821_v14 = vpop.permute.xlu1 %241  ;;  %v346_v15 = vpop.permute.xlu0 %345 }
  0x9e   : > { %v374_v57 = vmul.f32 %v843_v37, %v346_v15  ;;  %v271_v11 = vmul.f32 %v830_v24, %v821_v14 }
  0xa0   : > { %v279_v20 = vadd.f32 %v838_v31, %v271_v11 }
  0xa1   : > { %v823_v17 = vpop.permute.xlu1 %251 }
  0xa2   : > { %v286_v19 = vpop.permute.xlu0 %285 }
  0xa3   : > { %v320_v34 = vmul.f32 %v833_v30, %v286_v19 }
  0xa6   : > { %v290_v21 = vpop.permute.xlu1 %289  ;;  %v825_v22 = vpop.permute.xlu0 %305 }
  0xa7   : > { %v321_v46 = vmul.f32 %v833_v30, %v290_v21 }
  0xaa   : > { %v294_v26 = vpop.permute.xlu1 %293 }
  0xab   : > { %v227_v27 = vpop.permute.xlu0 %226  ;;  %v322_v49 = vmul.f32 %v833_v30, %v294_v26 }
  0xac   : > { %v268_v28 = vmul.f32 %v830_v24, %v227_v27 }
  0xad   : > { %v330_v58 = vadd.f32 %v322_v49, %v278_v53 }
  0xae   : > { %v276_v35 = vadd.f32 %v838_v31, %v268_v28 }
  0xaf   : > { %v342_v32 = vpop.permute.xlu1 %341  ;;  %v232_v33 = vpop.permute.xlu0 %231  ;;  %v382_v2 = vadd.f32 %v374_v57, %v330_v58 }
  0xb0   : > { %v269_v36 = vmul.f32 %v830_v24, %v232_v33  ;;  %v328_v41 = vadd.f32 %v320_v34, %v276_v35  ;;  %v373_v54 = vmul.f32 %v843_v37, %v342_v32  ;;  %v273_v33 = vmul.f32 %v830_v24, %v823_v17 }
  0xb2   : > { %v277_v43 = vadd.f32 %v838_v31, %v269_v36  ;;  %v380_v48 = vadd.f32 %v372_v40, %v328_v41  ;;  %v325_v36 = vmul.f32 %v833_v30, %v825_v22  ;;  %v281_v38 = vadd.f32 %v838_v31, %v273_v33 }
  0xb3   : > { %v247_v39 = vpop.permute.xlu0 %246 }
  0xb4   : > { %v298_v42 = vpop.permute.xlu1 %297  ;;  %v329_v50 = vadd.f32 %v321_v46, %v277_v43  ;;  %v272_v7 = vmul.f32 %v830_v24, %v247_v39  ;;  %v333_v41 = vadd.f32 %v325_v36, %v281_v38 }
  0xb5   : > { %v323_v13 = vmul.f32 %v833_v30, %v298_v42 }
  0xb6   : > { %v381_v59 = vadd.f32 %v373_v54, %v329_v50  ;;  %v280_v9 = vadd.f32 %v838_v31, %v272_v7 }
  0xb7   : > { %v851_v47 = vpop.permute.xlu0 %261  ;;  %v331_v25 = vadd.f32 %v323_v13, %v279_v20 }
  0xb9   : > { %v390_v51 = vpop.permute.xlu1 %389 }
  0xba   : > { %v424_v52 = vmul.f32 %v847_v44, %v390_v51 }
  0xbc   : > { %v857_v55 = vadd.f32 %v424_v52, %v380_v48  ;;  %v394_v56 = vpop.permute.xlu0 %393 }
  0xbd   : > { %v425_v60 = vmul.f32 %v847_v44, %v394_v56  ;;  %v275_v56 = vmul.f32 %v830_v24, %v851_v47 }
  0xbe   : > { %v440_v61 = vmax.f32 %v857_v55, 0.0  ;;  %v302_v62 = vpop.permute.xlu1 %301 }
  0xbf   : > { %v433_v63 = vadd.f32 %v425_v60, %v381_v59  ;;  %v324_v10 = vmul.f32 %v833_v30, %v302_v62 }
  0xc0   : > { %474 = vst.msk [vmem:[%s864_s12] sm:$0xff] %vm448_vm0, %v440_v61  ;;  %v398_v0 = vpop.permute.xlu0 %397  ;;  %v449_v57 = vsel %vm448_vm0, %v440_v61, 0.0 }
  0xc1   : > { %v441_v1 = vmax.f32 %v433_v63, 0.0  ;;  %v426_v3 = vmul.f32 %v847_v44, %v398_v0  ;;  %v332_v16 = vadd.f32 %v324_v10, %v280_v9 }
  0xc3   : > { %475 = vst.msk [vmem:[%s864_s12 + $0x8] sm:$0xff] %vm448_vm0, %v441_v1  ;;  %v434_v4 = vadd.f32 %v426_v3, %v382_v2  ;;  %v350_v5 = vpop.permute.xlu1 %349  ;;  %v450_v51 = vsel %vm448_vm0, %v441_v1, 0.0 }
  0xc4   : > { %v406_v12 = vpop.permute.xlu0 %405  ;;  %v375_v21 = vmul.f32 %v843_v37, %v350_v5  ;;  %v451_v59 = vadd.f32 %v450_v51, %v449_v57 }
  0xc5   : > { %v442_v6 = vmax.f32 %v434_v4, 0.0  ;;  %v428_v19 = vmul.f32 %v847_v44, %v406_v12  ;;  %v283_v4 = vadd.f32 %v838_v31, %v275_v56 }
  0xc6   : > { %v383_v14 = vadd.f32 %v375_v21, %v331_v25 }
  0xc7   : > { %476 = vst.msk [vmem:[%s864_s12 + $0x10] sm:$0xff] %vm448_vm0, %v442_v6  ;;  %v452_v58 = vsel %vm448_vm0, %v442_v6, 0.0 }
  0xc8   : > { %v257_v8 = vpop.permute.xlu1 %256  ;;  %v410_v39 = vpop.permute.xlu0 %409  ;;  %v453_v2 = vadd.f32 %v452_v58, %v451_v59 }
  0xc9   : > { %v429_v42 = vmul.f32 %v847_v44, %v410_v39  ;;  %v274_v17 = vmul.f32 %v830_v24, %v257_v8 }
  0xcb   : > { %v282_v22 = vadd.f32 %v838_v31, %v274_v17 }
  0xcc   : > { %v414_v52 = vpop.permute.xlu0 %413 }
  0xcd   : > { %v354_v15 = vpop.permute.xlu1 %353  ;;  %v430_v60 = vmul.f32 %v847_v44, %v414_v52 }
  0xce   : > { %v376_v18 = vmul.f32 %v843_v37, %v354_v15 }
  0xd0   : > { %v384_v23 = vadd.f32 %v376_v18, %v332_v16 }
  0xd2   : > { %v436_v26 = vadd.f32 %v428_v19, %v384_v23  ;;  %v402_v27 = vpop.permute.xlu1 %401 }
  0xd3   : > { %v427_v28 = vmul.f32 %v847_v44, %v402_v27 }
  0xd4   : > { %v444_v29 = vmax.f32 %v436_v26, 0.0 }
  0xd5   : > { %v435_v32 = vadd.f32 %v427_v28, %v383_v14 }
  0xd6   : > { %478 = vst.msk [vmem:[%s864_s12 + $0x20] sm:$0xff] %vm448_vm0, %v444_v29  ;;  %v456_v7 = vsel %vm448_vm0, %v444_v29, 0.0 }
  0xd7   : > { %v443_v34 = vmax.f32 %v435_v32, 0.0  ;;  %v310_v35 = vpop.permute.xlu1 %309 }
  0xd8   : > { %v326_v49 = vmul.f32 %v833_v30, %v310_v35 }
  0xd9   : > { %477 = vst.msk [vmem:[%s864_s12 + $0x18] sm:$0xff] %vm448_vm0, %v443_v34  ;;  %v454_v63 = vsel %vm448_vm0, %v443_v34, 0.0 }
  0xda   : > { %v334_v54 = vadd.f32 %v326_v49, %v282_v22  ;;  %v455_v47 = vadd.f32 %v454_v63, %v453_v2 }
  0xdc   : > { %v358_v40 = vpop.permute.xlu1 %357  ;;  %v457_v10 = vadd.f32 %v456_v7, %v455_v47 }
  0xdd   : > { %v377_v43 = vmul.f32 %v843_v37, %v358_v40 }
  0xdf   : > { %v385_v45 = vadd.f32 %v377_v43, %v333_v41 }
  0xe1   : > { %v437_v46 = vadd.f32 %v429_v42, %v385_v45  ;;  %v314_v48 = vpop.permute.xlu1 %313 }
  0xe2   : > { %v327_v0 = vmul.f32 %v833_v30, %v314_v48 }
  0xe3   : > { %v445_v50 = vmax.f32 %v437_v46, 0.0 }
  0xe4   : > { %v335_v5 = vadd.f32 %v327_v0, %v283_v4 }
  0xe5   : > { %479 = vst.msk [vmem:[%s864_s12 + $0x28] sm:$0xff] %vm448_vm0, %v445_v50  ;;  %v458_v8 = vsel %vm448_vm0, %v445_v50, 0.0 }
  0xe6   : > { %v362_v53 = vpop.permute.xlu1 %361  ;;  %v459_v11 = vadd.f32 %v458_v8, %v457_v10 }
  0xe7   : > { %v378_v55 = vmul.f32 %v843_v37, %v362_v53 }
  0xe9   : > { %v386_v62 = vadd.f32 %v378_v55, %v334_v54 }
  0xea   : > { %v366_v1 = vpop.permute.xlu1 %365 }
  0xeb   : > { %v438_v3 = vadd.f32 %v430_v60, %v386_v62  ;;  %v379_v24 = vmul.f32 %v843_v37, %v366_v1 }
  0xed   : > { %v446_v61 = vmax.f32 %v438_v3, 0.0  ;;  %v387_v30 = vadd.f32 %v379_v24, %v335_v5 }
  0xef   : > { %480 = vst.msk [vmem:[%s864_s12 + $0x30] sm:$0xff] %vm448_vm0, %v446_v61  ;;  %v418_v6 = vpop.permute.xlu1 %417  ;;  %v460_v31 = vsel %vm448_vm0, %v446_v61, 0.0 }
  0xf0   : > { %v431_v9 = vmul.f32 %v847_v44, %v418_v6  ;;  %v461_v13 = vadd.f32 %v460_v31, %v459_v11 }
  0xf2   : > { %v439_v37 = vadd.f32 %v431_v9, %v387_v30 }
  0xf4   : > { %v447_v12 = vmax.f32 %v439_v37, 0.0 }
  0xf6   : > { %v462_v15 = vsel %vm448_vm0, %v447_v12, 0.0  ;;  %481 = vst.msk [vmem:[%s864_s12 + $0x38] sm:$0xff] %vm448_vm0, %v447_v12 }
  0xf7   : > { %v463_v16 = vadd.f32 %v462_v15, %v461_v13 }
  0xf9   : > { %v464_v18 = vrot.slane %v463_v16, 4 }
  0xfb   : > { %v465_v19 = vadd.f32 %v464_v18, %v463_v16 }
  0xfd   : > { %v466_v20 = vrot.slane %v465_v19, 2 }
  0xff   : > { %v467_v21 = vadd.f32 %v466_v20, %v465_v19 }
 0x101   : > { %v468_v44 = vrot.slane %v467_v21, 1 }
 0x103   : > { %v469_v23 = vadd.f32 %v468_v44, %v467_v21 }
 0x105   : > { %v471_v25 = vmul.f32 0.015625, %v469_v23 }
 0x107   : > { %473 = vst.msk [vmem:[%s190_s20] sm:$0x1] %vm472_vm1, %v471_v25 }
 0x108   : > { %672 = shalt.err (!%p669_p3)
}
 0x109   : > { %s673_s7 = scalar_lea.hbm %s928_s28, 16  ;;  %s677_s10 = scalar_lea.hbm %s973_s3, 128 }
 0x10a   : > { %p674_p4 = scmp.ne.s32.totalorder %s928_s28, %s673_s7  ;;  %p678_p9 = scmp.lt.u32.totalorder %s928_s28, %s973_s3 }
 0x10b   : > { %p679_p10 = scmp.lt.u32.totalorder %s677_s10, %s673_s7  ;;  %p681_p12 = scmp.lt.u32.totalorder %s673_s7, %s928_s28 }
 0x10c   : > { %p675_p7 = pnand %p674_p4, %p791_p5 }
 0x10d   : > { %p680_p11 = por %p679_p10, %p678_p9 }
 0x10e   : > { %p676_p8 = pneg %p675_p7 }
 0x10f   : > { %p682_p13 = por %p681_p12, %p680_p11 }
 0x111   : > { %p683_p0 = pnand %p682_p13, %p676_p8 }
 0x113   : > { %686 = shalt.err (!%p683_p0)
}
 0x114   : > { %597 = dma.vmem_to_hbm [thread:$0]  (%p791_p5), %s930_s22, 16, %s928_s28, %s483_s29  }
 0x115 PF: > { %p603_p1 = scmp.ge.s32.totalorder %s721_s18, 2  ;;  %s515_s13 = sand.u32 1, %s709_s15  }
 0x116   : > { %s516_s14 = scalar_lea.sflag [#allocation3], %s515_s13 }
 0x117   : > { %p600_p2 = pnand %p603_p1, %p795_p6 }
 0x119   : > { %704 = dma.done.wait (!%p600_p2), %s516_s14, 16  }
 0x11a   : > { %706 = vsyncadd (!%p600_p2), %s516_s14, 4294967280  ;;  %p15_p3 = scmp.ge.s32.totalorder %s778_s21, 10   ;;  %s977_s15 = smov %s713_s16 }
 0x11b   : > { %s978_s16 = smov %s717_s17  ;;  %s979_s17 = smov %s789_s24 }
 0x11c   : > { %s980_s18 = smov %s778_s21  ;;  %17 = sbr.rel (!%p15_p3) target bundleno = 3 (0x3), region = 79 }
 0x123   :  { %528 = vsyncpa [#allocation3], 1 }
 0x124   :  { %530 = vsyncpa [#allocation3 + $0x1], 1 }

</bundles_post_ra>
